<compile_context>
chip_gen: v5e
topology: v5e:2x2
jax: 0.10.0
libtpu: 0.0.40
codegen_flags: <defaults>
</compile_context>

<pallas_src>
import jax
import jax.numpy as jnp
from jax.experimental import pallas as pl
from jax.experimental.pallas import tpu as pltpu


def _graph_attn_kernel(node_ref, eff_ref, head_ref, h_ref, w_t_ref, b_ref, out_ref):
    """Single invocation over the whole batch.

    Refs (full arrays, VMEM resident):
      node_ref : [B, N, E] f32   node embeddings
      eff_ref  : [B, N]    i32   node_efficient (0/1)
      head_ref : [B, N]    i32   head_flag_bit_matrix (0/1)
      h_ref    : [B, H]    f32   h_c_t
      w_t_ref  : [H, E]    f32   Linear weight, pre-transposed in the wrapper
      b_ref    : [1, E]    f32   Linear bias
      out_ref  : [B, E]    f32   node_context
    """
    node = node_ref[...]                                       # [B, N, E]

    # Query projection: tiny GEMM on the MXU, f32 accumulation.
    proj = jnp.dot(h_ref[...], w_t_ref[...],
                   preferred_element_type=jnp.float32) + b_ref[...]          # [B, E]

    # efficient_mask = (1 - node_efficient) | head_flag  -> additive f32 bias.
    mask = ((1 - eff_ref[...]) | head_ref[...]) != 0                          # [B, N] bool
    bias = jnp.where(mask, jnp.float32(-1e30), jnp.float32(0.0))              # [B, N]

    # scores[b, n] = sum_e node[b, n, e] * proj[b, e]   (VPU mul + lane reduce)
    scores = jnp.sum(node * proj[:, None, :], axis=-1) + bias                 # [B, N]

    # Masked softmax over nodes (all f32).
    m = jnp.max(scores, axis=-1, keepdims=True)                               # [B, 1]
    p = jnp.exp(scores - m)                                                   # [B, N]
    denom = jnp.sum(p, axis=-1, keepdims=True)                                # [B, 1]
    weights = p / denom                                                       # [B, N]

    # context[b, e] = sum_n weights[b, n] * node[b, n, e]  (VPU mul + sublane reduce)
    ctx = jnp.sum(weights[:, :, None] * node, axis=1)                         # [B, E]
    out_ref[...] = ctx.astype(out_ref.dtype)


def graph_attn(node_embedding, node_efficient, head_flag_bit_matrix, h_c_t, attn_w, attn_b):
    """Pallas wrapper. Returns node_context [B, E]."""
    B, N, E = node_embedding.shape

    node = node_embedding.astype(jnp.float32)
    h = h_c_t.astype(jnp.float32)
    w_t = attn_w.astype(jnp.float32).T                      # [H, E]  (layout plumbing only)
    b = attn_b.astype(jnp.float32).reshape(1, E)            # [1, E]
    eff = node_efficient.astype(jnp.int32)
    head = head_flag_bit_matrix.astype(jnp.int32)

    vmem = pl.BlockSpec(memory_space=pltpu.MemorySpace.VMEM)
    out = pl.pallas_call(
        _graph_attn_kernel,
        out_shape=jax.ShapeDtypeStruct((B, E), jnp.float32),
        in_specs=[vmem, vmem, vmem, vmem, vmem, vmem],
        out_specs=vmem,
    )(node, eff, head, h, w_t, b)

    return out


def graph_attn_ref(node_embedding, node_efficient, head_flag_bit_matrix, h_c_t, attn_w, attn_b):
    """Pure-JAX reference for correctness checking."""
    mask = ((1 - node_efficient) | head_flag_bit_matrix) != 0                # [B, N]
    proj = h_c_t @ attn_w.T + attn_b                                         # [B, E]
    scores = jnp.einsum("bne,be->bn", node_embedding, proj)                  # [B, N]
    scores = scores + jnp.where(mask, jnp.float32(-1e30), jnp.float32(0.0))
    weights = jax.nn.softmax(scores, axis=-1)
    return jnp.einsum("bn,bne->be", weights, node_embedding)                 # [B, E]


if __name__ == "__main__":
    # Small shapes consistent with the module: B=2 dialogs, N=16 graph nodes,
    # node_embed_dim E=32, hidden_dim H=32.
    B, N, E, H = 2, 16, 32, 32

    key = jax.random.PRNGKey(0)
    k_node, k_h, k_w, k_b, k_eff, k_head = jax.random.split(key, 6)

    node_embedding = jax.random.normal(k_node, (B, N, E), dtype=jnp.float32)
    h_c_t = jax.random.normal(k_h, (B, H), dtype=jnp.float32)

    # Deterministic parameter init mirroring nn.Linear(hidden_dim, node_embed_dim) defaults.
    bound = 1.0 / (H ** 0.5)
    attn_w = jax.random.uniform(k_w, (E, H), minval=-bound, maxval=bound, dtype=jnp.float32)
    attn_b = jax.random.uniform(k_b, (E,), minval=-bound, maxval=bound, dtype=jnp.float32)

    # 0/1 node_efficient and head_flag bits; force at least one attendable node per batch row
    # (fully-masked rows fall back to a uniform distribution with the -1e30 convention).
    node_efficient = jax.random.bernoulli(k_eff, 0.7, (B, N)).astype(jnp.int32)
    head_flag = jax.random.bernoulli(k_head, 0.2, (B, N)).astype(jnp.int32)
    node_efficient = node_efficient.at[:, 0].set(1)
    head_flag = head_flag.at[:, 0].set(0)

    out = graph_attn(node_embedding, node_efficient, head_flag, h_c_t, attn_w, attn_b)
    out = jax.block_until_ready(out)

    ref = graph_attn_ref(node_embedding, node_efficient, head_flag, h_c_t, attn_w, attn_b)
    assert out.shape == (B, E)
    assert jnp.allclose(out, ref, atol=1e-5, rtol=1e-5), "Pallas kernel mismatch vs JAX reference"

    print("KERNEL_OK")
</pallas_src>

<mosaic_0001>
module attributes {stable_mosaic.version = 11 : i64} {
  func.func @_graph_attn_kernel(%arg0: memref<2x16x32xf32, #tpu.memory_space<vmem>>, %arg1: memref<2x16xi32, #tpu.memory_space<vmem>>, %arg2: memref<2x16xi32, #tpu.memory_space<vmem>>, %arg3: memref<2x32xf32, #tpu.memory_space<vmem>>, %arg4: memref<32x32xf32, #tpu.memory_space<vmem>>, %arg5: memref<1x32xf32, #tpu.memory_space<vmem>>, %arg6: memref<2x32xf32, #tpu.memory_space<vmem>>) attributes {dimension_semantics = [], scalar_prefetch = 0 : i64, scratch_operands = 0 : i64, tpu.core_type = #tpu.core_type<tc>} {
    %c0 = arith.constant 0 : index
    %c0_0 = arith.constant 0 : index
    %c0_1 = arith.constant 0 : index
    %0 = vector.load %arg0[%c0, %c0_0, %c0_1] : memref<2x16x32xf32, #tpu.memory_space<vmem>>, vector<2x16x32xf32>
    %c0_2 = arith.constant 0 : index
    %c0_3 = arith.constant 0 : index
    %1 = vector.load %arg3[%c0_2, %c0_3] : memref<2x32xf32, #tpu.memory_space<vmem>>, vector<2x32xf32>
    %c0_4 = arith.constant 0 : index
    %c0_5 = arith.constant 0 : index
    %2 = vector.load %arg4[%c0_4, %c0_5] : memref<32x32xf32, #tpu.memory_space<vmem>>, vector<32x32xf32>
    %cst = arith.constant dense<0.000000e+00> : vector<2x32xf32>
    %3 = tpu.matmul %1, %2, %cst {dimension_numbers = #tpu.dot_dimension_numbers<[1], [0], [0], [1], [0, 0, 1, 1], [], []>} : vector<2x32xf32>, vector<32x32xf32>, vector<2x32xf32> -> vector<2x32xf32>
    %c0_6 = arith.constant 0 : index
    %c0_7 = arith.constant 0 : index
    %4 = vector.load %arg5[%c0_6, %c0_7] : memref<1x32xf32, #tpu.memory_space<vmem>>, vector<1x32xf32>
    %5 = vector.broadcast %4 : vector<1x32xf32> to vector<2x32xf32>
    %6 = arith.addf %3, %5 : vector<2x32xf32>
    %c0_8 = arith.constant 0 : index
    %c0_9 = arith.constant 0 : index
    %7 = vector.load %arg1[%c0_8, %c0_9] : memref<2x16xi32, #tpu.memory_space<vmem>>, vector<2x16xi32>
    %c1_i32 = arith.constant 1 : i32
    %8 = vector.broadcast %c1_i32 : i32 to vector<2x16xi32>
    %9 = arith.subi %8, %7 : vector<2x16xi32>
    %c0_10 = arith.constant 0 : index
    %c0_11 = arith.constant 0 : index
    %10 = vector.load %arg2[%c0_10, %c0_11] : memref<2x16xi32, #tpu.memory_space<vmem>>, vector<2x16xi32>
    %11 = arith.ori %9, %10 : vector<2x16xi32>
    %c0_i32 = arith.constant 0 : i32
    %12 = vector.broadcast %c0_i32 : i32 to vector<2x16xi32>
    %13 = arith.cmpi ne, %11, %12 : vector<2x16xi32>
    %cst_12 = arith.constant -1.000000e+30 : f32
    %cst_13 = arith.constant 0.000000e+00 : f32
    %14 = vector.broadcast %cst_12 : f32 to vector<2x16xf32>
    %15 = vector.broadcast %cst_13 : f32 to vector<2x16xf32>
    %16 = arith.select %13, %14, %15 : vector<2x16xi1>, vector<2x16xf32>
    %17 = vector.shape_cast %6 : vector<2x32xf32> to vector<2x1x32xf32>
    %18 = vector.broadcast %17 : vector<2x1x32xf32> to vector<2x16x32xf32>
    %19 = arith.mulf %0, %18 : vector<2x16x32xf32>
    %cst_14 = arith.constant dense<0.000000e+00> : vector<2x16xf32>
    %20 = vector.multi_reduction <add>, %19, %cst_14 [2] : vector<2x16x32xf32> to vector<2x16xf32>
    %21 = arith.addf %20, %16 : vector<2x16xf32>
    %cst_15 = arith.constant dense<0xFF800000> : vector<2xf32>
    %22 = vector.multi_reduction <maximumf>, %21, %cst_15 [1] : vector<2x16xf32> to vector<2xf32>
    %23 = vector.shape_cast %22 : vector<2xf32> to vector<2x1xf32>
    %24 = vector.broadcast %23 : vector<2x1xf32> to vector<2x16xf32>
    %25 = arith.subf %21, %24 : vector<2x16xf32>
    %26 = math.exp %25 : vector<2x16xf32>
    %cst_16 = arith.constant dense<0.000000e+00> : vector<2xf32>
    %27 = vector.multi_reduction <add>, %26, %cst_16 [1] : vector<2x16xf32> to vector<2xf32>
    %28 = vector.shape_cast %27 : vector<2xf32> to vector<2x1xf32>
    %29 = vector.broadcast %28 : vector<2x1xf32> to vector<2x16xf32>
    %30 = arith.divf %26, %29 : vector<2x16xf32>
    %31 = vector.shape_cast %30 : vector<2x16xf32> to vector<2x16x1xf32>
    %32 = vector.broadcast %31 : vector<2x16x1xf32> to vector<2x16x32xf32>
    %33 = arith.mulf %32, %0 : vector<2x16x32xf32>
    %cst_17 = arith.constant dense<0.000000e+00> : vector<2x32xf32>
    %34 = vector.multi_reduction <add>, %33, %cst_17 [1] : vector<2x16x32xf32> to vector<2x32xf32>
    %c0_18 = arith.constant 0 : index
    %c0_19 = arith.constant 0 : index
    %35 = vector.load %arg6[%c0_18, %c0_19] : memref<2x32xf32, #tpu.memory_space<vmem>>, vector<2x32xf32>
    tpu.vector_store %arg6[%c0_18, %c0_19], %34 {strides = array<i32>} : memref<2x32xf32, #tpu.memory_space<vmem>>, vector<2x32xf32>,
    return
  }
}

</mosaic_0001>

<bundles_post_ra>
// kernel: tpu_custom_call.1
= control target key start
LH: loop header
LB: loop body
LE: loop exit
PB: predicated region body
PF: predicated region fallthrough
CT: control target
= control target key end

     0   :  { %11 = vsyncpa [#allocation3], 0  ;;  %s623_s0 = inlined_call_operand.hbm [shape: f32[2,16,32], index: 0, kind: input, shape index: {}]   ;;  %s624_s1 = inlined_call_operand.hbm [shape: s32[2,16], index: 1, kind: input, shape index: {}]   ;;  %s625_s2 = inlined_call_operand.hbm [shape: s32[2,16], index: 2, kind: input, shape index: {}]   ;;  %s626_s3 = inlined_call_operand.vmem [shape: f32[2,32], index: 3, kind: input, shape index: {}]   ;;  %s627_s4 = inlined_call_operand.hbm [shape: f32[32,32], index: 4, kind: input, shape index: {}]   ;;  %s628_s5 = inlined_call_operand.vmem [shape: f32[1,32], index: 5, kind: input, shape index: {}]   ;;  %s629_s6 = inlined_call_operand.hbm [shape: f32[2,32], index: 6, kind: output, shape index: {}]  }
   0x1   :  { %12 = vsyncpa [#allocation6], 0 }
   0x2   :  { %13 = vsyncpa [#allocation9], 0  ;;  %s33_s23 = sshll.u32 %s624_s1, 4  ;;  %s34_s23 = int_to_ptr.hbm [resolvable:$true] %s33_s23 }
   0x3   :  { %14 = vsyncpa [#allocation4], 0  ;;  %s522_s24 = smov [#allocation5]   ;;  %s19_s28 = sshll.u32 %s623_s0, 4  ;;  %s20_s28 = int_to_ptr.hbm [resolvable:$true] %s19_s28 }
   0x4   :  { %s35_s25 = sshll.u32 %s522_s24, 4  ;;  %s523_s29 = smov [#allocation2]   ;;  %s36_s25 = int_to_ptr.vmem [resolvable:$true] %s35_s25 }
   0x5   :  { %38 = dma.hbm_to_vmem [thread:$0]  %s34_s23, 32, %s36_s25, [#allocation6]  }
   0x6   :  { %s21_s30 = sshll.u32 %s523_s29, 4  ;;  %s524_s7 = smov 128   ;;  %s22_s30 = int_to_ptr.vmem [resolvable:$true] %s21_s30 }
   0x7   :  { %s525_s8 = smov 8   ;;  %s44_s1 = sshll.u32 %s625_s2, 4  ;;  %s45_s1 = int_to_ptr.hbm [resolvable:$true] %s44_s1 }
   0x8   :  { %27 = dma.hbm_to_vmem [thread:$0]  %s20_s28, 512, %s22_s30, [#allocation3], %s524_s7, %s524_s7, %s525_s8  }
   0x9   :  { %s526_s11 = smov [#allocation7]   ;;  %s56_s0 = sshll.u32 %s627_s4, 4  ;;  %s57_s0 = int_to_ptr.hbm [resolvable:$true] %s56_s0 }
   0xa   :  { %s46_s12 = sshll.u32 %s526_s11, 4  ;;  %s527_s15 = smov [#allocation8]   ;;  %s47_s12 = int_to_ptr.vmem [resolvable:$true] %s46_s12 }
   0xb   :  { %49 = dma.hbm_to_vmem [thread:$0]  %s45_s1, 32, %s47_s12, [#allocation6]  }
   0xc   :  { %s58_s16 = sshll.u32 %s527_s15, 4  ;;  %s59_s16 = int_to_ptr.vmem [resolvable:$true] %s58_s16 }
   0xd   :  { %64 = dma.hbm_to_vmem [thread:$0]  %s57_s0, 512, %s59_s16, [#allocation9], %s524_s7, %s524_s7, %s525_s8  }
   0xe   :  { %514 = dma.done.wait [#allocation3], 512  }
   0xf   :  { %515 = vsyncadd [#allocation3], 4294966784 }
  0x10   :  { %516 = dma.done.wait [#allocation6], 64  }
  0x11   :  { %517 = vsyncadd [#allocation6], 4294967232 }
  0x12   :  { %518 = dma.done.wait [#allocation9], 512  }
  0x13   :  { %519 = vsyncadd [#allocation9], 4294966784  ;;  %v91_v0 = vld [vmem:[#allocation8 + $0x18] sm:$0xff]  ;;  %v90_v1 = vld [vmem:[#allocation8 + $0x10] sm:$0xff]  ;;  %vm96_vm0 = vcmask 261120   ;;  %v150_v5 = vlaneseq  ;;  %v528_v12 = vmov 0.0  }
  0x14   :  { %112 = vmatpush.msra.mxu0 %v91_v0  ;;  %v89_v2 = vld [vmem:[#allocation8 + $0x8] sm:$0xff]  ;;  %v88_v3 = vld [vmem:[#allocation8] sm:$0xff]  ;;  %v87_v4 = vld [vmem:[%s626_s3] sm:$0x3]  ;;  %v529_v34 = vmov 0   ;;  %vm204_vm2 = vcmask 130112  }
  0x15   :  { %v151_v6 = vshrl.u32 %v150_v5, 7  ;;  %v120_v7 = vld [vmem:[#allocation5] sm:$0x3]  ;;  %v122_v9 = vld [vmem:[#allocation7] sm:$0x3]  ;;  %v588_v21 = vld [vmem:[#allocation2 + $0x10] sm:$0xff] }
  0x16   :  { %113 = vmatpush.msra.mxu0 %v90_v1  ;;  %v121_v8 = vsub.s32 1, %v120_v7  ;;  %v381_v15 = vld [vmem:[%s628_s5] ss:$0 sm:$0xff]  ;;  %v593_v26 = vld [vmem:[#allocation2 + $0x8] sm:$0xff]  ;;  %v596_v28 = vld [vmem:[#allocation2 + $0x18] sm:$0xff]  ;;  %v200_v50 = vand.u32 127, %v150_v5 }
  0x17   :  { %374 = vset.pattern.permute.xlu2 %v151_v6  ;;  %376 = vset.pattern.permute.xlu0 %v151_v6  ;;  %v158_v10 = vadd.s32 8, %v151_v6  ;;  %v586_v18 = vld [vmem:[#allocation2] sm:$0xff]  ;;  %vm209_vm3 = vcmask 1041409   ;;  %vm212_vm4 = vcmask 123904   ;;  %s530_s5 = smov [#allocation10]   ;;  %s352_s21 = sshll.u32 %s629_s6, 4  ;;  %s353_s21 = int_to_ptr.hbm [resolvable:$true] %s352_s21 }
  0x18   :  { %114 = vmatpush.msra.mxu0 %v89_v2  ;;  %v123_v11 = vor.u32 %v122_v9, %v121_v8  ;;  %v202_v51 = vadd.s32 4294967288, %v200_v50  ;;  %s350_s18 = sshll.u32 %s530_s5, 4  ;;  %vm343_vm13 = vcmask 254976   ;;  %s351_s18 = int_to_ptr.vmem [resolvable:$true] %s350_s18 }
  0x19   :  { %377 = vset.pattern.permute.xlu1 %v158_v10 }
  0x1a   :  { %115 = vmatpush.msra.mxu0 %v88_v3  ;;  %vm124_vm1 = vcmp.ne.s32.totalorder %v123_v11, 0 }
  0x1b   :  { %364 = vmatmul.msk.f32.vlgmr.msra.gmra.mxu0 %vm96_vm0, %v87_v4  ;;  %v125_v13 = vsel %vm124_vm1, -1e+30, %v528_v12 }
  0x1c   :  { %v149_v14 = vperm.slane %v125_v13, 0  ;;  %v162_v33 = vperm.slane %v125_v13, 1 }
  0x1f   :  { %154 = vperm.xlu2 %374, %v149_v14  }
  0x27   :  { %375 = vset.pattern.permute.xlu2 %v158_v10 }
  0x2f   :  { %160 = vperm.xlu2 %375, %v149_v14  }
  0x37   :  { %378 = vset.pattern.permute.xlu2 %v529_v34 }
  0x79   :  { %v155_v35 = vpop.permute.xlu2 %154 }
  0x89   :  { %v161_v38 = vpop.permute.xlu2 %160 }
  0x98   :  { %v117_v16 = vpop.f32.mrf.mxu0 }
  0x99   :  { %v118_v17 = vadd.f32 %v381_v15, %v117_v16 }
  0x9b   :  { %v127_v19 = vrot.slane %v118_v17, 1  ;;  %v128_v20 = vperm.slane %v118_v17, 0 }
  0x9d   :  { %v129_v22 = vperm.slane %v127_v19, 0  ;;  %v132_v23 = vmul.f32 %v128_v20, %v586_v18  ;;  %v133_v29 = vmul.f32 %v128_v20, %v593_v26 }
  0x9f   :  { %v136_v24 = vsel %vm96_vm0, %v132_v23, 0.0  ;;  %v134_v25 = vmul.f32 %v129_v22, %v588_v21  ;;  %v135_v30 = vmul.f32 %v129_v22, %v596_v28  ;;  %v139_v31 = vsel %vm96_vm0, %v133_v29, 0.0 }
  0xa0   :  { %137 = vadd.xlane.f32.xlu0 %v136_v24 }
  0xa1   :  { %v142_v27 = vsel %vm96_vm0, %v134_v25, 0.0  ;;  %v145_v32 = vsel %vm96_vm0, %v135_v30, 0.0 }
  0xa2   :  { %143 = vadd.xlane.f32.xlu1 %v142_v27 }
  0xa8   :  { %140 = vadd.xlane.f32.xlu0 %v139_v31 }
  0xaa   :  { %146 = vadd.xlane.f32.xlu1 %v145_v32 }
  0xbc   :  { %167 = vperm.xlu0 %376, %v162_v33  }
  0xc3   :  { %173 = vperm.xlu1 %377, %v162_v33  }
  0xc4   :  { %379 = vset.pattern.permute.xlu0 %v529_v34 }
  0xcb   :  { %380 = vset.pattern.permute.xlu1 %v529_v34 }
 0x113   :  { %v138_v36 = vpop.xlane.xlu0 %137 }
 0x114   :  { %v179_v37 = vadd.f32 %v155_v35, %v138_v36 }
 0x115   :  { %v144_v41 = vpop.xlane.xlu1 %143 }
 0x116   :  { %188 = vperm.xlu2 %378, %v179_v37  }
 0x11b   :  { %v141_v39 = vpop.xlane.xlu0 %140 }
 0x11c   :  { %v180_v40 = vadd.f32 %v161_v38, %v141_v39 }
 0x11d   :  { %v147_v42 = vpop.xlane.xlu1 %146 }
 0x11e   :  { %191 = vperm.xlu2 %378, %v180_v40  }
 0x12e   :  { %v168_v43 = vpop.permute.xlu0 %167 }
 0x12f   :  { %v181_v44 = vadd.f32 %v168_v43, %v144_v41 }
 0x131   :  { %194 = vperm.xlu2 %378, %v181_v44  }
 0x135   :  { %v174_v45 = vpop.permute.xlu1 %173 }
 0x136   :  { %v182_v46 = vadd.f32 %v174_v45, %v147_v42 }
 0x139   :  { %197 = vperm.xlu2 %378, %v182_v46  }
 0x170   :  { %v189_v47 = vpop.permute.xlu2 %188 }
 0x171   :  { %v201_v54 = vperm.slane %v189_v47, %v200_v50 }
 0x178   :  { %v192_v48 = vpop.permute.xlu2 %191 }
 0x179   :  { %v203_v52 = vperm.slane %v192_v48, %v202_v51 }
 0x17b   :  { %v205_v57 = vsel %vm204_vm2, %v203_v52, %v201_v54 }
 0x18b   :  { %v195_v49 = vpop.permute.xlu2 %194 }
 0x18c   :  { %v206_v55 = vperm.slane %v195_v49, %v200_v50 }
 0x193   :  { %v198_v53 = vpop.permute.xlu2 %197 }
 0x194   :  { %v207_v56 = vperm.slane %v198_v53, %v202_v51 }
 0x196   :  { %v208_v58 = vsel %vm204_vm2, %v207_v56, %v206_v55 }
 0x197   :  { %v210_v59 = vsel %vm209_vm3, %v208_v58, %v205_v57 }
 0x198   :  { %v213_v60 = vsel %vm212_vm4, %v210_v59, -inf }
 0x199   :  { %214 = vmax.xlane.f32.xlu1 %v213_v60 }
 0x20c   :  { %v215_v61 = vpop.xlane.xlu1 %214 }
 0x20d   :  { %v217_v62 = vperm.slane %v215_v61, 0  ;;  %v218_v63 = vperm.slane %v215_v61, 1 }
 0x20f   :  { %v221_v0 = vsub.f32 %v179_v37, %v217_v62  ;;  %v222_v1 = vsub.f32 %v180_v40, %v217_v62  ;;  %v223_v4 = vsub.f32 %v181_v44, %v218_v63  ;;  %v224_v8 = vsub.f32 %v182_v46, %v218_v63 }
 0x211   :  { %v225_v2 = vmul.f32 1.442695, %v221_v0  ;;  %v227_v3 = vmul.f32 1.442695, %v222_v1  ;;  %v229_v5 = vmul.f32 1.442695, %v223_v4 }
 0x212   :  { %v231_v9 = vmul.f32 1.442695, %v224_v8 }
 0x213   :  { %382 = vpow2.f32 %v225_v2 }
 0x214   :  { %384 = vpow2.f32 %v227_v3 }
 0x215   :  { %386 = vpow2.f32 %v229_v5 }
 0x216   :  { %388 = vpow2.f32 %v231_v9 }
 0x219   :  { %v383_v6 = vpop.eup %382 }
 0x21a   :  { %v385_v7 = vpop.eup %384  ;;  %238 = vperm.xlu2 %378, %v383_v6  }
 0x21b   :  { %241 = vperm.xlu0 %379, %v385_v7   ;;  %v387_v10 = vpop.eup %386 }
 0x21c   :  { %v389_v11 = vpop.eup %388 }
 0x222   :  { %244 = vperm.xlu2 %378, %v387_v10  }
 0x22a   :  { %247 = vperm.xlu2 %378, %v389_v11  }
 0x274   :  { %v239_v12 = vpop.permute.xlu2 %238 }
 0x275   :  { %v249_v17 = vperm.slane %v239_v12, %v200_v50 }
 0x27c   :  { %v245_v13 = vpop.permute.xlu2 %244 }
 0x27d   :  { %v252_v19 = vperm.slane %v245_v13, %v200_v50 }
 0x284   :  { %v248_v14 = vpop.permute.xlu2 %247 }
 0x285   :  { %v253_v15 = vperm.slane %v248_v14, %v202_v51 }
 0x287   :  { %v254_v23 = vsel %vm204_vm2, %v253_v15, %v252_v19 }
 0x28d   :  { %v242_v16 = vpop.permute.xlu0 %241 }
 0x28e   :  { %v250_v20 = vperm.slane %v242_v16, %v202_v51 }
 0x290   :  { %v251_v22 = vsel %vm204_vm2, %v250_v20, %v249_v17 }
 0x291   :  { %v255_v24 = vsel %vm209_vm3, %v254_v23, %v251_v22 }
 0x292   :  { %v257_v25 = vsel %vm212_vm4, %v255_v24, 0.0 }
 0x293   :  { %258 = vadd.xlane.f32.xlu0 %v257_v25 }
 0x306   :  { %v259_v27 = vpop.xlane.xlu0 %258 }
 0x307   :  { %v261_v29 = vperm.slane %v259_v27, 0  ;;  %v262_v30 = vperm.slane %v259_v27, 1 }
 0x309   :  { %390 = vrcp.f32 %v261_v29  ;;  %v276_v37 = vand.u32 2147483648, %v261_v29  ;;  %v292_v38 = vand.u32 2147483648, %v262_v30  ;;  %v274_v40 = vand.u32 2147483647, %v261_v29 }
 0x30a   :  { %392 = vrcp.f32 %v262_v30  ;;  %v290_v42 = vand.u32 2147483647, %v262_v30  ;;  %vm270_vm7 = vweird.f32 %v261_v29  ;;  %vm286_vm8 = vweird.f32 %v262_v30 }
 0x30b   :  { %v277_v45 = vor.u32 1.1754944e-38, %v276_v37  ;;  %v293_v46 = vor.u32 1.1754944e-38, %v292_v38  ;;  %vm275_vm11 = vcmp.eq.f32.partialorder %v274_v40, 8.507059e+37 }
 0x30c   :  { %vm291_vm12 = vcmp.eq.f32.partialorder %v290_v42, 8.507059e+37 }
 0x30f   :  { %v391_v31 = vpop.eup %390 }
 0x310   :  { %v393_v32 = vpop.eup %392  ;;  %v266_v33 = vmul.f32 %v391_v31, %v261_v29  ;;  %vm271_vm5 = vweird.f32 %v391_v31 }
 0x311   :  { %v282_v34 = vmul.f32 %v393_v32, %v262_v30  ;;  %vm287_vm6 = vweird.f32 %v393_v32  ;;  %vm272_vm9 = vmor %vm270_vm7, %vm271_vm5 }
 0x312   :  { %v267_v35 = vsub.f32 1.0, %v266_v33  ;;  %vm288_vm10 = vmor %vm286_vm8, %vm287_vm6 }
 0x313   :  { %v283_v36 = vsub.f32 1.0, %v282_v34 }
 0x314   :  { %v268_v39 = vmul.f32 %v391_v31, %v267_v35 }
 0x315   :  { %v284_v41 = vmul.f32 %v393_v32, %v283_v36 }
 0x316   :  { %v269_v43 = vadd.f32 %v391_v31, %v268_v39 }
 0x317   :  { %v285_v44 = vadd.f32 %v393_v32, %v284_v41 }
 0x318   :  { %v273_v47 = vsel %vm272_vm9, %v391_v31, %v269_v43 }
 0x319   :  { %v289_v48 = vsel %vm288_vm10, %v393_v32, %v285_v44  ;;  %v278_v49 = vsel %vm275_vm11, %v277_v45, %v273_v47 }
 0x31a   :  { %v294_v50 = vsel %vm291_vm12, %v293_v46, %v289_v48  ;;  %v279_v51 = vmul.f32 %v383_v6, %v278_v49  ;;  %v280_v53 = vmul.f32 %v385_v7, %v278_v49 }
 0x31b   :  { %v295_v52 = vmul.f32 %v387_v10, %v294_v50  ;;  %v296_v54 = vmul.f32 %v389_v11, %v294_v50 }
 0x31c   :  { %299 = vperm.xlu2 %378, %v279_v51  }
 0x31d   :  { %309 = vperm.xlu1 %380, %v295_v52  }
 0x324   :  { %304 = vperm.xlu2 %378, %v280_v53  }
 0x32c   :  { %314 = vperm.xlu2 %378, %v296_v54  }
 0x376   :  { %v300_v55 = vpop.permute.xlu2 %299 }
 0x377   :  { %v317_v58 = vmul.f32 %v300_v55, %v586_v18 }
 0x379   :  { %v321_v60 = vsel %vm96_vm0, %v317_v58, 0.0 }
 0x37e   :  { %v305_v56 = vpop.permute.xlu2 %304 }
 0x37f   :  { %v318_v57 = vmul.f32 %v305_v56, %v593_v26 }
 0x381   :  { %v322_v59 = vsel %vm96_vm0, %v318_v57, 0.0 }
 0x382   :  { %v323_v61 = vadd.f32 %v322_v59, %v321_v60 }
 0x384   :  { %v324_v62 = vrot.slane %v323_v61, 4 }
 0x386   :  { %v315_v63 = vpop.permute.xlu2 %314  ;;  %v325_v1 = vadd.f32 %v324_v62, %v323_v61 }
 0x387   :  { %v320_v0 = vmul.f32 %v315_v63, %v596_v28 }
 0x388   :  { %v326_v26 = vrot.slane %v325_v1, 2 }
 0x389   :  { %v331_v4 = vsel %vm96_vm0, %v320_v0, 0.0 }
 0x38a   :  { %v327_v7 = vadd.f32 %v326_v26, %v325_v1 }
 0x38c   :  { %v328_v10 = vrot.slane %v327_v7, 1 }
 0x38f   :  { %v310_v2 = vpop.permute.xlu1 %309 }
 0x390   :  { %v319_v3 = vmul.f32 %v310_v2, %v588_v21  ;;  %v329_v21 = vadd.f32 %v328_v10, %v327_v7 }
 0x392   :  { %v330_v5 = vsel %vm96_vm0, %v319_v3, 0.0 }
 0x393   :  { %v332_v6 = vadd.f32 %v331_v4, %v330_v5 }
 0x395   :  { %v333_v18 = vrot.slane %v332_v6, 4 }
 0x397   :  { %v334_v8 = vadd.f32 %v333_v18, %v332_v6 }
 0x399   :  { %v335_v9 = vrot.slane %v334_v8, 2 }
 0x39b   :  { %v336_v11 = vadd.f32 %v335_v9, %v334_v8 }
 0x39d   :  { %v337_v12 = vrot.slane %v336_v11, 1 }
 0x39f   :  { %v338_v28 = vadd.f32 %v337_v12, %v336_v11 }
 0x3a1   :  { %v341_v13 = vsel %vm209_vm3, %v338_v28, %v329_v21 }
 0x3a2   :  { %344 = vst.msk [vmem:[#allocation10] sm:$0x3] %vm343_vm13, %v341_v13 }
 0x3a3   :  { %355 = dma.vmem_to_hbm [thread:$0]  %s351_s18, 32, %s353_s21, [#allocation4]  }
 0x3a4   :  { %520 = dma.done.wait [#allocation4], 32  }
 0x3a5   :  { %521 = vsyncadd [#allocation4], 4294967264 }
 0x3a6   :  { %360 = vsyncpa [#allocation3], 1 }
 0x3a7   :  { %361 = vsyncpa [#allocation6], 1 }
 0x3a8   :  { %362 = vsyncpa [#allocation9], 1 }
 0x3a9   :  { %363 = vsyncpa [#allocation4], 1 }

</bundles_post_ra>
